<compile_context>
chip_gen: v5e
topology: v5e:2x2
jax: 0.10.0
libtpu: 0.0.40
codegen_flags: <defaults>
</compile_context>

<pallas_src>
import jax
import jax.numpy as jnp
from jax import lax
from jax.experimental import pallas as pl
from jax.experimental.pallas import tpu as pltpu  # noqa: F401  (imported for completeness)

N_ITERS = 200          # solver threshold from solver_kwargs={'threshold': 200, 'eps': 0.001}
EPS = 1e-3             # solver eps
CHUNK = 8              # Picard steps per convergence check (unrolled)
MAX_CHUNKS = N_ITERS // CHUNK


def deq_kernel(x_ref, awT_ref, ab_ref, bwT_ref, bb_ref, hwT_ref, hb_ref, y_ref):
    x = x_ref[...]
    bwT = bwT_ref[...]

    # A(x) + bias(A) + bias(B): constant across fixed-point iterations, hoist it.
    ax = (jnp.dot(x, awT_ref[...], preferred_element_type=jnp.float32)
          + ab_ref[...] + bb_ref[...])

    z0 = jnp.zeros((x.shape[0], bwT.shape[1]), jnp.float32)

    def step(z):
        # f(x, z) = tanh(A(x) + B(z)); add + tanh stay in f32 (v5e has no bf16 VPU/EUP).
        return jnp.tanh(ax + jnp.dot(z, bwT, preferred_element_type=jnp.float32))

    # TODO(synk): reference uses Anderson acceleration; here a plain Picard
    # iteration with the same eps=1e-3 / threshold=200 stopping rule is used —
    # f is contractive (0.1-scaled weights), so it reaches the same fixed point.
    def cond(carry):
        it, res, _ = carry
        return jnp.logical_and(it < MAX_CHUNKS, res > EPS)

    def body(carry):
        it, _, z = carry
        z_prev = z
        for _ in range(CHUNK):          # unrolled at trace time
            z_prev = z
            z = step(z)
        res = jnp.max(jnp.abs(z - z_prev))   # residual of the last step, checked once per chunk
        return it + 1, res, z

    _, _, z_star_ = lax.while_loop(
        cond, body, (jnp.int32(0), jnp.float32(jnp.inf), z0))

    # Final f application (the one done with grad enabled in the reference).
    z_star = step(z_star_)

    # y = h(z_star)
    y = jnp.dot(z_star, hwT_ref[...], preferred_element_type=jnp.float32) + hb_ref[...]
    y_ref[...] = y.astype(y_ref.dtype)


def deq_forward(x, awT, ab2, bwT, bb2, hwT, hb2):
    B = x.shape[0]
    n_out = hwT.shape[1]

    def full_spec(a):
        # full-array block (satisfies the (8,128) rule because block == array dims)
        return pl.BlockSpec(a.shape, lambda: (0,) * a.ndim)

    return pl.pallas_call(
        deq_kernel,
        out_shape=jax.ShapeDtypeStruct((B, n_out), x.dtype),
        in_specs=[full_spec(x), full_spec(awT), full_spec(ab2),
                  full_spec(bwT), full_spec(bb2),
                  full_spec(hwT), full_spec(hb2)],
        out_specs=pl.BlockSpec((B, n_out), lambda: (0, 0)),
    )(x, awT, ab2, bwT, bb2, hwT, hb2)


def init_params(key, n_in, n_states, n_out):
    """Deterministic PyTorch-style Linear init (U(-1/sqrt(fan_in), 1/sqrt(fan_in))),
    with A.weight and B.weight scaled by 0.1 as in DEQ.__init__."""
    ks = jax.random.split(key, 6)

    def lin(kw, kb, fan_in, fan_out):
        bound = 1.0 / jnp.sqrt(fan_in)
        w = jax.random.uniform(kw, (fan_out, fan_in), jnp.float32, -bound, bound)
        b = jax.random.uniform(kb, (fan_out,), jnp.float32, -bound, bound)
        return w, b

    a_w, a_b = lin(ks[0], ks[1], n_in, n_states)
    b_w, b_b = lin(ks[2], ks[3], n_states, n_states)
    h_w, h_b = lin(ks[4], ks[5], n_states, n_out)
    a_w = 0.1 * a_w
    b_w = 0.1 * b_w
    return a_w, a_b, b_w, b_b, h_w, h_b


def deq_reference_converged(x, a_w, a_b, b_w, b_b, h_w, h_b):
    """Plain-JAX reference, iterated to (numerical) convergence."""
    ax = x @ a_w.T + a_b + b_b
    z = jnp.zeros((x.shape[0], b_w.shape[0]), jnp.float32)
    for _ in range(N_ITERS):
        z = jnp.tanh(ax + z @ b_w.T)
    z_star = jnp.tanh(ax + z @ b_w.T)
    return z_star @ h_w.T + h_b


def deq_reference_early_stop(x, a_w, a_b, b_w, b_b, h_w, h_b):
    """Plain-JAX mirror of the kernel's chunked eps-based Picard iteration."""
    ax = x @ a_w.T + a_b + b_b
    z = jnp.zeros((x.shape[0], b_w.shape[0]), jnp.float32)
    it, res = 0, float("inf")
    while it < MAX_CHUNKS and res > EPS:
        for _ in range(CHUNK):
            z_prev = z
            z = jnp.tanh(ax + z @ b_w.T)
        res = float(jnp.max(jnp.abs(z - z_prev)))
        it += 1
    z_star = jnp.tanh(ax + z @ b_w.T)
    return z_star @ h_w.T + h_b


if __name__ == "__main__":
    # Small shapes consistent with the module's Linear layers.
    batch, n_in, n_states, n_out = 8, 4, 32, 4

    key = jax.random.PRNGKey(0)
    k_x, k_p = jax.random.split(key)
    x = jax.random.normal(k_x, (batch, n_in), jnp.float32)

    a_w, a_b, b_w, b_b, h_w, h_b = init_params(k_p, n_in, n_states, n_out)

    # Pre-transpose weights / reshape biases for the kernel's row-major layout.
    awT = jnp.transpose(a_w)          # [n_in, n_states]
    bwT = jnp.transpose(b_w)          # [n_states, n_states]
    hwT = jnp.transpose(h_w)          # [n_states, n_out]
    ab2 = a_b.reshape(1, n_states)
    bb2 = b_b.reshape(1, n_states)
    hb2 = h_b.reshape(1, n_out)

    y = deq_forward(x, awT, ab2, bwT, bb2, hwT, hb2)
    y = jax.block_until_ready(y)
    assert y.shape == (batch, n_out)

    # (1) Exact-math check against a plain-JAX mirror of the kernel's solver.
    y_mirror = deq_reference_early_stop(x, a_w, a_b, b_w, b_b, h_w, h_b)
    assert jnp.allclose(y, y_mirror, atol=1e-4, rtol=1e-4), (y, y_mirror)

    # (2) Fixed-point check against a fully converged reference (within solver eps).
    y_exact = deq_reference_converged(x, a_w, a_b, b_w, b_b, h_w, h_b)
    assert jnp.allclose(y, y_exact, atol=2e-3, rtol=2e-3), (y, y_exact)

    print("KERNEL_OK")
</pallas_src>

<mosaic_0001>
module attributes {stable_mosaic.version = 11 : i64} {
  func.func @deq_kernel(%arg0: memref<8x4xf32, #tpu.memory_space<vmem>>, %arg1: memref<4x32xf32, #tpu.memory_space<vmem>>, %arg2: memref<1x32xf32, #tpu.memory_space<vmem>>, %arg3: memref<32x32xf32, #tpu.memory_space<vmem>>, %arg4: memref<1x32xf32, #tpu.memory_space<vmem>>, %arg5: memref<32x4xf32, #tpu.memory_space<vmem>>, %arg6: memref<1x4xf32, #tpu.memory_space<vmem>>, %arg7: memref<8x4xf32, #tpu.memory_space<vmem>>) attributes {dimension_semantics = [], scalar_prefetch = 0 : i64, scratch_operands = 0 : i64, tpu.core_type = #tpu.core_type<tc>} {
    %c0 = arith.constant 0 : index
    %c0_0 = arith.constant 0 : index
    %0 = vector.load %arg0[%c0, %c0_0] : memref<8x4xf32, #tpu.memory_space<vmem>>, vector<8x4xf32>
    %c0_1 = arith.constant 0 : index
    %c0_2 = arith.constant 0 : index
    %1 = vector.load %arg3[%c0_1, %c0_2] : memref<32x32xf32, #tpu.memory_space<vmem>>, vector<32x32xf32>
    %c0_3 = arith.constant 0 : index
    %c0_4 = arith.constant 0 : index
    %2 = vector.load %arg1[%c0_3, %c0_4] : memref<4x32xf32, #tpu.memory_space<vmem>>, vector<4x32xf32>
    %cst = arith.constant dense<0.000000e+00> : vector<8x32xf32>
    %3 = tpu.matmul %0, %2, %cst {dimension_numbers = #tpu.dot_dimension_numbers<[1], [0], [0], [1], [0, 0, 1, 1], [], []>} : vector<8x4xf32>, vector<4x32xf32>, vector<8x32xf32> -> vector<8x32xf32>
    %c0_5 = arith.constant 0 : index
    %c0_6 = arith.constant 0 : index
    %4 = vector.load %arg2[%c0_5, %c0_6] : memref<1x32xf32, #tpu.memory_space<vmem>>, vector<1x32xf32>
    %5 = vector.broadcast %4 : vector<1x32xf32> to vector<8x32xf32>
    %6 = arith.addf %3, %5 : vector<8x32xf32>
    %c0_7 = arith.constant 0 : index
    %c0_8 = arith.constant 0 : index
    %7 = vector.load %arg4[%c0_7, %c0_8] : memref<1x32xf32, #tpu.memory_space<vmem>>, vector<1x32xf32>
    %8 = vector.broadcast %7 : vector<1x32xf32> to vector<8x32xf32>
    %9 = arith.addf %6, %8 : vector<8x32xf32>
    %cst_9 = arith.constant 0.000000e+00 : f32
    %10 = vector.broadcast %cst_9 : f32 to vector<8x32xf32>
    %c0_i32 = arith.constant 0 : i32
    %cst_10 = arith.constant 0x7F800000 : f32
    %11:3 = scf.while (%arg8 = %c0_i32, %arg9 = %cst_10, %arg10 = %10) : (i32, f32, vector<8x32xf32>) -> (i32, f32, vector<8x32xf32>) {
      %c25_i32 = arith.constant 25 : i32
      %21 = arith.cmpi slt, %arg8, %c25_i32 : i32
      %cst_19 = arith.constant 1.000000e-03 : f32
      %22 = arith.cmpf ogt, %arg9, %cst_19 : f32
      %23 = arith.andi %21, %22 : i1
      scf.condition(%23) %arg8, %arg9, %arg10 : i32, f32, vector<8x32xf32>
    } do {
    ^bb0(%arg8: i32, %arg9: f32, %arg10: vector<8x32xf32>):
      %cst_19 = arith.constant dense<0.000000e+00> : vector<8x32xf32>
      %21 = tpu.matmul %arg10, %1, %cst_19 {dimension_numbers = #tpu.dot_dimension_numbers<[1], [0], [0], [1], [0, 0, 1, 1], [], []>} : vector<8x32xf32>, vector<32x32xf32>, vector<8x32xf32> -> vector<8x32xf32>
      %22 = arith.addf %9, %21 : vector<8x32xf32>
      %23 = math.tanh %22 : vector<8x32xf32>
      %cst_20 = arith.constant dense<0.000000e+00> : vector<8x32xf32>
      %24 = tpu.matmul %23, %1, %cst_20 {dimension_numbers = #tpu.dot_dimension_numbers<[1], [0], [0], [1], [0, 0, 1, 1], [], []>} : vector<8x32xf32>, vector<32x32xf32>, vector<8x32xf32> -> vector<8x32xf32>
      %25 = arith.addf %9, %24 : vector<8x32xf32>
      %26 = math.tanh %25 : vector<8x32xf32>
      %cst_21 = arith.constant dense<0.000000e+00> : vector<8x32xf32>
      %27 = tpu.matmul %26, %1, %cst_21 {dimension_numbers = #tpu.dot_dimension_numbers<[1], [0], [0], [1], [0, 0, 1, 1], [], []>} : vector<8x32xf32>, vector<32x32xf32>, vector<8x32xf32> -> vector<8x32xf32>
      %28 = arith.addf %9, %27 : vector<8x32xf32>
      %29 = math.tanh %28 : vector<8x32xf32>
      %cst_22 = arith.constant dense<0.000000e+00> : vector<8x32xf32>
      %30 = tpu.matmul %29, %1, %cst_22 {dimension_numbers = #tpu.dot_dimension_numbers<[1], [0], [0], [1], [0, 0, 1, 1], [], []>} : vector<8x32xf32>, vector<32x32xf32>, vector<8x32xf32> -> vector<8x32xf32>
      %31 = arith.addf %9, %30 : vector<8x32xf32>
      %32 = math.tanh %31 : vector<8x32xf32>
      %cst_23 = arith.constant dense<0.000000e+00> : vector<8x32xf32>
      %33 = tpu.matmul %32, %1, %cst_23 {dimension_numbers = #tpu.dot_dimension_numbers<[1], [0], [0], [1], [0, 0, 1, 1], [], []>} : vector<8x32xf32>, vector<32x32xf32>, vector<8x32xf32> -> vector<8x32xf32>
      %34 = arith.addf %9, %33 : vector<8x32xf32>
      %35 = math.tanh %34 : vector<8x32xf32>
      %cst_24 = arith.constant dense<0.000000e+00> : vector<8x32xf32>
      %36 = tpu.matmul %35, %1, %cst_24 {dimension_numbers = #tpu.dot_dimension_numbers<[1], [0], [0], [1], [0, 0, 1, 1], [], []>} : vector<8x32xf32>, vector<32x32xf32>, vector<8x32xf32> -> vector<8x32xf32>
      %37 = arith.addf %9, %36 : vector<8x32xf32>
      %38 = math.tanh %37 : vector<8x32xf32>
      %cst_25 = arith.constant dense<0.000000e+00> : vector<8x32xf32>
      %39 = tpu.matmul %38, %1, %cst_25 {dimension_numbers = #tpu.dot_dimension_numbers<[1], [0], [0], [1], [0, 0, 1, 1], [], []>} : vector<8x32xf32>, vector<32x32xf32>, vector<8x32xf32> -> vector<8x32xf32>
      %40 = arith.addf %9, %39 : vector<8x32xf32>
      %41 = math.tanh %40 : vector<8x32xf32>
      %cst_26 = arith.constant dense<0.000000e+00> : vector<8x32xf32>
      %42 = tpu.matmul %41, %1, %cst_26 {dimension_numbers = #tpu.dot_dimension_numbers<[1], [0], [0], [1], [0, 0, 1, 1], [], []>} : vector<8x32xf32>, vector<32x32xf32>, vector<8x32xf32> -> vector<8x32xf32>
      %43 = arith.addf %9, %42 : vector<8x32xf32>
      %44 = math.tanh %43 : vector<8x32xf32>
      %45 = arith.subf %44, %41 : vector<8x32xf32>
      %46 = math.absf %45 : vector<8x32xf32>
      %47 = vector.shape_cast %46 : vector<8x32xf32> to vector<1x8x32xf32>
      %cst_27 = arith.constant dense<0xFF800000> : vector<1xf32>
      %48 = vector.multi_reduction <maximumf>, %47, %cst_27 [1, 2] : vector<1x8x32xf32> to vector<1xf32>
      %49 = vector.shape_cast %48 : vector<1xf32> to vector<1x1x1xf32>
      %50 = vector.extract %49[0, 0, 0] : f32 from vector<1x1x1xf32>
      %c1_i32 = arith.constant 1 : i32
      %51 = arith.addi %arg8, %c1_i32 : i32
      scf.yield %51, %50, %44 : i32, f32, vector<8x32xf32>
    }
    %cst_11 = arith.constant dense<0.000000e+00> : vector<8x32xf32>
    %12 = tpu.matmul %11#2, %1, %cst_11 {dimension_numbers = #tpu.dot_dimension_numbers<[1], [0], [0], [1], [0, 0, 1, 1], [], []>} : vector<8x32xf32>, vector<32x32xf32>, vector<8x32xf32> -> vector<8x32xf32>
    %13 = arith.addf %9, %12 : vector<8x32xf32>
    %14 = math.tanh %13 : vector<8x32xf32>
    %c0_12 = arith.constant 0 : index
    %c0_13 = arith.constant 0 : index
    %15 = vector.load %arg5[%c0_12, %c0_13] : memref<32x4xf32, #tpu.memory_space<vmem>>, vector<32x4xf32>
    %cst_14 = arith.constant dense<0.000000e+00> : vector<8x4xf32>
    %16 = tpu.matmul %14, %15, %cst_14 {dimension_numbers = #tpu.dot_dimension_numbers<[1], [0], [0], [1], [0, 0, 1, 1], [], []>} : vector<8x32xf32>, vector<32x4xf32>, vector<8x4xf32> -> vector<8x4xf32>
    %c0_15 = arith.constant 0 : index
    %c0_16 = arith.constant 0 : index
    %17 = vector.load %arg6[%c0_15, %c0_16] : memref<1x4xf32, #tpu.memory_space<vmem>>, vector<1x4xf32>
    %18 = vector.broadcast %17 : vector<1x4xf32> to vector<8x4xf32>
    %19 = arith.addf %16, %18 : vector<8x4xf32>
    %c0_17 = arith.constant 0 : index
    %c0_18 = arith.constant 0 : index
    %20 = vector.load %arg7[%c0_17, %c0_18] : memref<8x4xf32, #tpu.memory_space<vmem>>, vector<8x4xf32>
    tpu.vector_store %arg7[%c0_17, %c0_18], %19 {strides = array<i32>} : memref<8x4xf32, #tpu.memory_space<vmem>>, vector<8x4xf32>,
    return
  }
}

</mosaic_0001>

<bundles_post_ra>
// kernel: tpu_custom_call.1
= control target key start
LH: loop header
LB: loop body
LE: loop exit
PB: predicated region body
PF: predicated region fallthrough
CT: control target
= control target key end

     0   :  { %vm40_vm0 = vcmask 1043456   ;;  %vm36_vm1 = vcmask 31744   ;;  %v508_v11 = vmov 0.0   ;;  %s596_s1 = inlined_call_operand.vmem [shape: f32[4,32], index: 1, kind: input, shape index: {}]   ;;  %s597_s3 = inlined_call_operand.vmem [shape: f32[32,32], index: 3, kind: input, shape index: {}]   ;;  %s598_s5 = inlined_call_operand.vmem [shape: f32[32,4], index: 5, kind: input, shape index: {}]   ;;  %s599_s6 = inlined_call_operand.vmem [shape: f32[1,4], index: 6, kind: input, shape index: {}]   ;;  %s600_s7 = inlined_call_operand.vmem [shape: f32[8,4], index: 7, kind: output, shape index: {}]   ;;  %s601_s0 = inlined_call_operand.vmem [shape: f32[8,4], index: 0, kind: input, shape index: {}]   ;;  %s602_s2 = inlined_call_operand.vmem [shape: f32[1,32], index: 2, kind: input, shape index: {}]   ;;  %s603_s4 = inlined_call_operand.vmem [shape: f32[1,32], index: 4, kind: input, shape index: {}]  }
   0x1   :  { %v476_v0 = vld [vmem:[%s597_s3] sm:$0xff]  ;;  %v481_v1 = vld [vmem:[%s597_s3 + $0x8] sm:$0xff]  ;;  %v486_v2 = vld [vmem:[%s597_s3 + $0x10] sm:$0xff] }
   0x2   :  { %v491_v3 = vld [vmem:[%s597_s3 + $0x18] sm:$0xff]  ;;  %v31_v4 = vld [vmem:[%s596_s1] sm:$0xf]  ;;  %s510_s1 = smov 0  }
   0x3   :  { %v26_v5 = vld [vmem:[%s601_s0] sm:$0xff]  ;;  %366 = vmatpush.msk.msra.mxu0 %vm40_vm0, %v31_v4 }
   0x4   :  { %367 = vmatmul.msk.f32.vlgmr.msra.gmra.mxu0 %vm36_vm1, %v26_v5  ;;  %v396_v6 = vld [vmem:[%s602_s2] ss:$0 sm:$0xff] }
   0x5   :  { %v397_v7 = vld [vmem:[%s603_s4] ss:$0 sm:$0xff] }
  0x81   :  { %v61_v8 = vpop.f32.mrf.mxu0 }
  0x82   :  { %v62_v9 = vadd.f32 %v396_v6, %v61_v8 }
  0x84   :  { %v506_v10 = vadd.f32 %v397_v7, %v62_v9 }
  0x85 LB: > { %95 = vmatpush.msra.mxu0 %v491_v3  ;;  %120 = vmatpush.msra.mxu1 %v491_v3  ;;  %vm79_vm2 = vcmask 261120   ;;  %s292_s1 = sadd.s32 1, %s431_s1   ;;  %s431_s1 = sphi %s510_s1, %s292_s1   ;;  %v427_v11 = vphi %v508_v11, %v604_v11  }
  0x86   : > { %145 = vmatpush.msra.mxu2 %v491_v3  ;;  %170 = vmatpush.msra.mxu3 %v491_v3  ;;  %p73_p0 = scmp.lt.s32.totalorder %s292_s1, 25 }
  0x87   : > { %96 = vmatpush.msra.mxu0 %v486_v2  ;;  %121 = vmatpush.msra.mxu1 %v486_v2 }
  0x88   : > { %146 = vmatpush.msra.mxu2 %v486_v2  ;;  %171 = vmatpush.msra.mxu3 %v486_v2 }
  0x89   : > { %97 = vmatpush.msra.mxu0 %v481_v1  ;;  %122 = vmatpush.msra.mxu1 %v481_v1 }
  0x8a   : > { %147 = vmatpush.msra.mxu2 %v481_v1  ;;  %172 = vmatpush.msra.mxu3 %v481_v1 }
  0x8b   : > { %98 = vmatpush.msra.mxu0 %v476_v0  ;;  %123 = vmatpush.msra.mxu1 %v476_v0 }
  0x8c   : > { %368 = vmatmul.msk.f32.vlgmr.msra.gmra.mxu0 %vm79_vm2, %v427_v11  ;;  %148 = vmatpush.msra.mxu2 %v476_v0 }
  0x8d   : > { %173 = vmatpush.msra.mxu3 %v476_v0  ;;  %195 = vmatpush.msrb.mxu0 %v491_v3 }
  0x8e   : > { %220 = vmatpush.msrb.mxu1 %v491_v3  ;;  %245 = vmatpush.msrb.mxu2 %v491_v3 }
  0x8f   : > { %196 = vmatpush.msrb.mxu0 %v486_v2  ;;  %270 = vmatpush.msrb.mxu3 %v491_v3 }
  0x90   : > { %221 = vmatpush.msrb.mxu1 %v486_v2  ;;  %246 = vmatpush.msrb.mxu2 %v486_v2 }
  0x91   : > { %197 = vmatpush.msrb.mxu0 %v481_v1  ;;  %271 = vmatpush.msrb.mxu3 %v486_v2 }
  0x92   : > { %222 = vmatpush.msrb.mxu1 %v481_v1  ;;  %247 = vmatpush.msrb.mxu2 %v481_v1 }
  0x93   : > { %198 = vmatpush.msrb.mxu0 %v476_v0  ;;  %272 = vmatpush.msrb.mxu3 %v481_v1 }
  0x94   : > { %223 = vmatpush.msrb.mxu1 %v476_v0  ;;  %248 = vmatpush.msrb.mxu2 %v476_v0 }
  0x95   : > { %273 = vmatpush.msrb.mxu3 %v476_v0 }
 0x109   : > { %v100_v12 = vpop.f32.mrf.mxu0 }
 0x10a   : > { %v103_v13 = vadd.f32 %v100_v12, %v506_v10 }
 0x10c   : > { %398 = vtanh.f32 %v103_v13 }
 0x112   : > { %v399_v14 = vpop.eup %398 }
 0x113   : > { %369 = vmatmul.msk.f32.vlgmr.msra.gmra.mxu1 %vm79_vm2, %v399_v14 }
 0x190   : > { %v125_v15 = vpop.f32.mrf.mxu1 }
 0x191   : > { %v128_v16 = vadd.f32 %v125_v15, %v506_v10 }
 0x193   : > { %400 = vtanh.f32 %v128_v16 }
 0x199   : > { %v401_v17 = vpop.eup %400 }
 0x19a   : > { %370 = vmatmul.msk.f32.vlgmr.msra.gmra.mxu2 %vm79_vm2, %v401_v17 }
 0x21d   : > { %v150_v18 = vpop.f32.mrf.mxu2 }
 0x21e   : > { %v153_v19 = vadd.f32 %v150_v18, %v506_v10 }
 0x220   : > { %402 = vtanh.f32 %v153_v19 }
 0x226   : > { %v403_v20 = vpop.eup %402 }
 0x227   : > { %371 = vmatmul.msk.f32.vlgmr.msra.gmra.mxu3 %vm79_vm2, %v403_v20 }
 0x2aa   : > { %v175_v21 = vpop.f32.mrf.mxu3 }
 0x2ab   : > { %v178_v22 = vadd.f32 %v175_v21, %v506_v10 }
 0x2ad   : > { %404 = vtanh.f32 %v178_v22 }
 0x2b3   : > { %v405_v23 = vpop.eup %404 }
 0x2b4   : > { %372 = vmatmul.msk.f32.vlgmr.msrb.gmra.mxu0 %vm79_vm2, %v405_v23 }
 0x331   : > { %v200_v24 = vpop.f32.mrf.mxu0 }
 0x332   : > { %v203_v25 = vadd.f32 %v200_v24, %v506_v10 }
 0x334   : > { %406 = vtanh.f32 %v203_v25 }
 0x33a   : > { %v407_v26 = vpop.eup %406 }
 0x33b   : > { %373 = vmatmul.msk.f32.vlgmr.msrb.gmra.mxu1 %vm79_vm2, %v407_v26 }
 0x3b8   : > { %v225_v27 = vpop.f32.mrf.mxu1 }
 0x3b9   : > { %v228_v28 = vadd.f32 %v225_v27, %v506_v10 }
 0x3bb   : > { %408 = vtanh.f32 %v228_v28 }
 0x3c1   : > { %v409_v29 = vpop.eup %408 }
 0x3c2   : > { %374 = vmatmul.msk.f32.vlgmr.msrb.gmra.mxu2 %vm79_vm2, %v409_v29 }
 0x445   : > { %v250_v30 = vpop.f32.mrf.mxu2 }
 0x446   : > { %v253_v31 = vadd.f32 %v250_v30, %v506_v10 }
 0x448   : > { %410 = vtanh.f32 %v253_v31 }
 0x44e   : > { %v411_v32 = vpop.eup %410 }
 0x44f   : > { %375 = vmatmul.msk.f32.vlgmr.msrb.gmra.mxu3 %vm79_vm2, %v411_v32 }
 0x4d2   : > { %v275_v33 = vpop.f32.mrf.mxu3 }
 0x4d3   : > { %v278_v34 = vadd.f32 %v275_v33, %v506_v10 }
 0x4d5   : > { %412 = vtanh.f32 %v278_v34 }
 0x4db   : > { %v413_v35 = vpop.eup %412  }
 0x4dc   : > { %v280_v36 = vsub.f32 %v413_v35, %v411_v32  ;;  %v604_v11 = vmov %v413_v35 }
 0x4de   : > { %v281_v37 = vand.u32 2147483647, %v280_v36 }
 0x4e0   : > { %v282_v38 = vsel %vm79_vm2, %v281_v37, -inf }
 0x4e1   : > { %283 = vmax.xlane.f32.xlu0 %v282_v38 }
 0x554   : > { %v284_v39 = vpop.xlane.xlu0 %283 }
 0x555   : > { %v285_v40 = vrot.slane %v284_v39, 4 }
 0x557   : > { %v286_v41 = vmax.f32 %v284_v39, %v285_v40 }
 0x559   : > { %v287_v42 = vrot.slane %v286_v41, 2 }
 0x55b   : > { %v288_v43 = vmax.f32 %v286_v41, %v287_v42 }
 0x55d   : > { %v289_v44 = vrot.slane %v288_v43, 1 }
 0x55f   : > { %v290_v45 = vmax.f32 %v288_v43, %v289_v44 }
 0x561   : > { %378 = vpush %v290_v45 }
 0x592   : > { %s379_s0 = spop %378 }
 0x593   : > { %p74_p1 = scmp.gt.f32.partialorder %s379_s0, 0.001 }
 0x595   : > { %p75_p2 = pnand %p74_p1, %p73_p0 }
 0x596   :  { %309 = vmatpush.msra.mxu0 (%p75_p2), %v491_v3  ;;  %v322_v46 = vld [vmem:[%s598_s5 + $0x18] sm:$0xff] (%p75_p2)  ;;  %v321_v47 = vld [vmem:[%s598_s5 + $0x10] sm:$0xff] (%p75_p2)  ;;  %v320_v48 = vld [vmem:[%s598_s5 + $0x8] sm:$0xff] (%p75_p2) }
 0x597   :  { %78 = sbr.rel (!%p75_p2) target bundleno = 133 (0x85), region = 55  ;;  %342 = vmatpush.msra.mxu1 (%p75_p2), %v322_v46  ;;  %v319_v49 = vld [vmem:[%s598_s5] sm:$0xff] (%p75_p2) }
 0x598   :  { %310 = vmatpush.msra.mxu0 (%p75_p2), %v486_v2  ;;  %v414_v53 = vld [vmem:[%s599_s6] ss:$0 sm:$0xff] (%p75_p2) }
 0x599   :  { %343 = vmatpush.msra.mxu1 (%p75_p2), %v321_v47 }
 0x59a   :  { %311 = vmatpush.msra.mxu0 (%p75_p2), %v481_v1 }
 0x59b   :  { %344 = vmatpush.msra.mxu1 (%p75_p2), %v320_v48 }
 0x59c   :  { %312 = vmatpush.msra.mxu0 %v476_v0 }
 0x59d   :  { %376 = vmatmul.msk.f32.vlgmr.msra.gmra.mxu0 %vm79_vm2, %v413_v35  ;;  %345 = vmatpush.msra.mxu1 %v319_v49 }
 0x61a   :  { %v314_v50 = vpop.f32.mrf.mxu0 }
 0x61b   :  { %v317_v51 = vadd.f32 %v314_v50, %v506_v10 }
 0x61d   :  { %415 = vtanh.f32 %v317_v51 }
 0x623   :  { %v416_v52 = vpop.eup %415 }
 0x624   :  { %377 = vmatmul.msk.f32.vlgmr.msra.gmra.mxu1 %vm79_vm2, %v416_v52 }
 0x6a1   :  { %v347_v54 = vpop.f32.mrf.mxu1 }
 0x6a2   :  { %v348_v55 = vadd.f32 %v414_v53, %v347_v54 }
 0x6a4   :  { %350 = vst.msk [vmem:[%s600_s7] sm:$0xff] %vm36_vm1, %v348_v55 }

</bundles_post_ra>
